<compile_context>
chip_gen: v7x
topology: tpu7x:2x2x1
jax: 0.10.0
libtpu: 0.0.40
codegen_flags: <defaults>
</compile_context>

<pallas_src>
import functools

import jax
import jax.numpy as jnp
from jax.experimental import pallas as pl
from jax.experimental.pallas import tpu as pltpu

NEG_SLOPE = 0.01  # torch.nn.LeakyReLU default


def _leaky(x):
    # max-form LeakyReLU (valid for slope < 1): mul + max instead of cmp+mul+sel.
    return jnp.maximum(x, NEG_SLOPE * x)


def _round_up(x, m):
    return ((x + m - 1) // m) * m


def _vmem_capacity_bytes():
    try:
        return int(pltpu.get_tpu_info().vmem_capacity_bytes)
    except Exception:
        return 64 * 1024 * 1024  # v7x-safe fallback


def _affinity_kernel(xl_ref, xp_ref, w1_ref, b1_ref, w2_ref, b2_ref,
                     w3_ref, m_ref, out_ref, acc_ref, *, k_tiles, compute_dtype):
    """Grid = (protein-tile groups [parallel], tiles per group [reduction])."""
    k = pl.program_id(1)

    @pl.when(k == 0)
    def _():
        acc_ref[...] = jnp.zeros_like(acc_ref)

    xl = xl_ref[...]                       # (Lp, Hp)      compute_dtype
    xp = xp_ref[...]                       # (tile_p, Hp)  compute_dtype
    Lp, Hp = xl.shape
    tp = xp.shape[0]

    # Pairwise elementwise product over hidden, flattened so the MXU sees an
    # (Lp * tile_p, Hp) LHS.  No mask: padded protein rows are corrected by a
    # constant term in the wrapper.
    v = (xl[:, None, :] * xp[None, :, :]).reshape(Lp * tp, Hp)

    # interaction_mlp: Linear + LeakyReLU (low-precision MXU inputs, f32 acc,
    # bias add + activation kept in f32).
    h1 = jnp.dot(v, w1_ref[...], preferred_element_type=jnp.float32) + b1_ref[...]
    h1 = _leaky(h1)

    # mlp_affinity first layer: Linear + LeakyReLU
    h2 = jnp.dot(h1.astype(compute_dtype), w2_ref[...],
                 preferred_element_type=jnp.float32) + b2_ref[...]
    h2 = _leaky(h2)

    # Running per-atom sum over proteins.
    acc_ref[...] += h2.reshape(Lp, tp, Hp).sum(axis=1)

    # Linear tail, hoisted: runs once per group on the last reduction step.
    # b3 and the padded-protein-row correction are applied in the wrapper.
    @pl.when(k == k_tiles - 1)
    def _():
        scores = jnp.dot(acc_ref[...], w3_ref[...],
                         preferred_element_type=jnp.float32)           # (Lp, 1)
        out_row = jnp.sum(scores * m_ref[...], axis=0, keepdims=True)  # (1, Gp)
        out_ref[...] = out_row.reshape(1, 1, -1)


@functools.partial(
    jax.jit,
    static_argnames=("num_ligands", "tile_p", "n_core_groups", "compute_dtype"))
def affinity_head(x_protein, x_ligand, ligand_batch, num_ligands, params,
                  tile_p=None, n_core_groups=1, compute_dtype=jnp.bfloat16):
    """Pallas forward of AffinityHead.  Returns (num_ligands,) float32."""
    P, H = x_protein.shape
    L = x_ligand.shape[0]
    G = int(num_ligands)
    w1, b1, w2, b2, w3, b3 = params
    f32 = jnp.float32
    cbytes = jnp.dtype(compute_dtype).itemsize

    # TPU-friendly padded shapes.  Padded hidden columns stay zero through both
    # layers (leaky(0)=0); padded atoms are killed by all-zero membership rows;
    # padded protein rows are corrected by a constant term below.
    Hp = _round_up(H, 128)
    Lp = _round_up(max(L, 1), 8)
    Gp = _round_up(max(G, 1), 128)

    vmem_cap = _vmem_capacity_bytes()

    # Protein tile: largest tile keeping the big (Lp*tile_p, Hp) intermediates
    # within ~3/8 of this generation's VMEM.
    if tile_p is None:
        budget = (vmem_cap * 3) // 8
        per_elem = 3 * 4 + 3 * cbytes            # live f32 + compute_dtype copies
        t = budget // max(1, per_elem * Lp * Hp)
        cap = 1024 if vmem_cap >= 96 * (1 << 20) else 512
        tile_p = int(max(8, min(cap, (t // 8) * 8)))
    tile_p = int(max(8, min(int(tile_p), _round_up(P, 8))))
    tile_p = (tile_p // 8) * 8

    total_tiles = -(-P // tile_p)                       # cdiv
    n_groups = int(max(1, min(int(n_core_groups), total_tiles)))
    k_tiles = -(-total_tiles // n_groups)
    Pp = tile_p * k_tiles * n_groups
    n_pad = Pp - P

    xpn = jnp.pad(x_protein.astype(f32), ((0, Pp - P), (0, Hp - H))).astype(compute_dtype)
    xln = jnp.pad(x_ligand.astype(f32), ((0, Lp - L), (0, Hp - H))).astype(compute_dtype)
    w1p = jnp.pad(w1.astype(f32), ((0, Hp - H), (0, Hp - H))).astype(compute_dtype)
    w2p = jnp.pad(w2.astype(f32), ((0, Hp - H), (0, Hp - H))).astype(compute_dtype)
    b1p = jnp.pad(b1.reshape(1, H).astype(f32), ((0, 0), (0, Hp - H)))
    b2p = jnp.pad(b2.reshape(1, H).astype(f32), ((0, 0), (0, Hp - H)))
    w3p = jnp.pad(w3.astype(f32), ((0, Hp - H), (0, 0)))
    b3s = jnp.asarray(b3, f32).reshape(())

    # One-hot ligand membership (Lp, Gp); padded rows/cols are all zero.
    membership = (ligand_batch[:, None] == jnp.arange(G)[None, :]).astype(f32)
    counts = jnp.sum(membership, axis=0)                  # atoms per ligand (G,)
    membership = jnp.pad(membership, ((0, Lp - L), (0, Gp - G)))

    kernel = functools.partial(_affinity_kernel, k_tiles=k_tiles,
                               compute_dtype=compute_dtype)

    const = lambda g, k: (0, 0)
    single = pl.Buffered(1)      # constant-index operands: no double buffering

    # Rough VMEM footprint: big intermediates + single-buffered constants +
    # double-buffered protein tile; 2x headroom, clamped below VMEM capacity.
    est = (Lp * tile_p * Hp * (2 * 4 + 3 * cbytes)
           + 2 * Hp * Hp * cbytes + 3 * Hp * 4
           + Lp * Hp * cbytes + 2 * tile_p * Hp * cbytes
           + Lp * Gp * 4 + Lp * Hp * 4 + 2 * Gp * 4)
    vmem_limit = int(min(vmem_cap - 12 * (1 << 20), max(32 * (1 << 20), 2 * est)))
    vmem_limit = max(vmem_limit, 16 * (1 << 20))

    out = pl.pallas_call(
        kernel,
        out_shape=jax.ShapeDtypeStruct((n_groups, 1, Gp), jnp.float32),
        grid_spec=pltpu.PrefetchScalarGridSpec(
            num_scalar_prefetch=0,
            grid=(n_groups, k_tiles),
            in_specs=[
                pl.BlockSpec((Lp, Hp), const, pipeline_mode=single),   # x_ligand
                pl.BlockSpec((tile_p, Hp),
                             lambda g, k: (g * k_tiles + k, 0)),       # protein tile
                pl.BlockSpec((Hp, Hp), const, pipeline_mode=single),   # W1
                pl.BlockSpec((1, Hp), const, pipeline_mode=single),    # b1
                pl.BlockSpec((Hp, Hp), const, pipeline_mode=single),   # W2
                pl.BlockSpec((1, Hp), const, pipeline_mode=single),    # b2
                pl.BlockSpec((Hp, 1), const, pipeline_mode=single),    # w3
                pl.BlockSpec((Lp, Gp), const, pipeline_mode=single),   # membership
            ],
            out_specs=pl.BlockSpec((1, 1, Gp), lambda g, k: (g, 0, 0)),
            scratch_shapes=[pltpu.VMEM((Lp, Hp), jnp.float32)],
        ),
        compiler_params=pltpu.CompilerParams(
            dimension_semantics=("parallel", "arbitrary"),
            vmem_limit_bytes=vmem_limit),
    )(xln, xpn, w1p, b1p, w2p, b2p, w3p, membership)

    # Sum per-group partials (one partial per TensorCore group on v7x).
    partial = out.sum(axis=0)[0, :G]

    # Exact tail corrections, applied exactly once in the wrapper:
    #   * each zero-padded protein row contributes the constant
    #     leaky(leaky(b1) @ W2 + b2) @ w3 to every atom -> subtract n_pad * c,
    #   * the final bias contributes P * b3 per atom (only valid proteins).
    h1c = _leaky(b1p)
    h2c = _leaky(jnp.dot(h1c.astype(compute_dtype), w2p,
                         preferred_element_type=jnp.float32) + b2p)
    pad_score = jnp.dot(h2c, w3p, preferred_element_type=jnp.float32)[0, 0]

    return partial + counts * (float(P) * b3s - float(n_pad) * pad_score)


def make_params(key, hidden_dim, bias_scale=0.1):
    """Xavier-normal weights (in, out layout); small nonzero biases so the
    bias paths and the padded-protein correction are actually exercised."""
    k1, k2, k3, k4, k5, k6 = jax.random.split(key, 6)

    def xavier(k, fan_in, fan_out):
        std = (2.0 / (fan_in + fan_out)) ** 0.5
        return std * jax.random.normal(k, (fan_in, fan_out), jnp.float32)

    w1 = xavier(k1, hidden_dim, hidden_dim)
    w2 = xavier(k2, hidden_dim, hidden_dim)
    w3 = xavier(k3, hidden_dim, 1)
    b1 = bias_scale * jax.random.normal(k4, (1, hidden_dim), jnp.float32)
    b2 = bias_scale * jax.random.normal(k5, (1, hidden_dim), jnp.float32)
    b3 = bias_scale * jax.random.normal(k6, (1, 1), jnp.float32)
    return (w1, b1, w2, b2, w3, b3)


def reference(x_protein, x_ligand, ligand_batch, num_ligands, params,
              matmul_dtype=jnp.float32):
    """Pure-JAX reference (equal to the padded to_dense_batch path).
    matmul_dtype mirrors the kernel's MXU/product precision."""
    w1, b1, w2, b2, w3, b3 = params
    L, H = x_ligand.shape
    P = x_protein.shape[0]
    Z = jnp.einsum('ik,jk->ijk', x_ligand.astype(matmul_dtype),
                   x_protein.astype(matmul_dtype)).reshape(L * P, H)
    h1 = jax.nn.leaky_relu(
        jnp.dot(Z, w1.astype(matmul_dtype),
                preferred_element_type=jnp.float32) + b1, NEG_SLOPE)
    h2 = jax.nn.leaky_relu(
        jnp.dot(h1.astype(matmul_dtype), w2.astype(matmul_dtype),
                preferred_element_type=jnp.float32) + b2, NEG_SLOPE)
    s = (jnp.dot(h2, w3, preferred_element_type=jnp.float32) + b3).reshape(L, P)
    per_atom = s.sum(axis=1)
    return jax.ops.segment_sum(per_atom, ligand_batch, num_segments=num_ligands)


if __name__ == "__main__":
    key = jax.random.PRNGKey(0)
    k_prot, k_lig, k_param, k_prot2, k_lig2 = jax.random.split(key, 5)

    hidden_dim = 32
    params = make_params(k_param, hidden_dim)

    # --- case 1: tiny shapes, single tile / single group --------------------
    P1, L1, G1 = 16, 8, 2
    x_protein1 = jax.random.normal(k_prot, (P1, hidden_dim), jnp.float32)
    x_ligand1 = jax.random.normal(k_lig, (L1, hidden_dim), jnp.float32)
    ligand_batch1 = jnp.array([0, 0, 0, 1, 1, 1, 1, 1], jnp.int32)

    out1 = jax.block_until_ready(
        affinity_head(x_protein1, x_ligand1, ligand_batch1, G1, params))
    ref1 = reference(x_protein1, x_ligand1, ligand_batch1, G1, params,
                     matmul_dtype=jnp.bfloat16)  # reference at MXU precision
    assert out1.shape == (G1,)
    assert jnp.allclose(out1, ref1, rtol=1e-2, atol=1e-2), (out1, ref1)

    # f32 compute path against the plain f32 reference (structural check).
    out1_f32 = jax.block_until_ready(
        affinity_head(x_protein1, x_ligand1, ligand_batch1, G1, params,
                      compute_dtype=jnp.float32))
    ref1_f32 = reference(x_protein1, x_ligand1, ligand_batch1, G1, params)
    assert jnp.allclose(out1_f32, ref1_f32, rtol=2e-2, atol=5e-2), (out1_f32, ref1_f32)

    # --- case 2: P not divisible by the tile, two groups, padded L/G --------
    P2, L2, G2 = 40, 12, 3
    x_protein2 = jax.random.normal(k_prot2, (P2, hidden_dim), jnp.float32)
    x_ligand2 = jax.random.normal(k_lig2, (L2, hidden_dim), jnp.float32)
    ligand_batch2 = jnp.array([0] * 4 + [1] * 3 + [2] * 5, jnp.int32)

    out2 = jax.block_until_ready(
        affinity_head(x_protein2, x_ligand2, ligand_batch2, G2, params,
                      tile_p=16, n_core_groups=2))
    ref2 = reference(x_protein2, x_ligand2, ligand_batch2, G2, params,
                     matmul_dtype=jnp.bfloat16)
    assert out2.shape == (G2,)
    assert jnp.allclose(out2, ref2, rtol=1e-2, atol=1e-2), (out2, ref2)

    print("KERNEL_OK")
</pallas_src>

<mosaic_0001>
module attributes {stable_mosaic.version = 11 : i64} {
  func.func @_affinity_kernel(%arg0: i32, %arg1: i32, %arg2: memref<8x128xbf16, #tpu.memory_space<vmem>>, %arg3: memref<16x128xbf16, #tpu.memory_space<vmem>>, %arg4: memref<128x128xbf16, #tpu.memory_space<vmem>>, %arg5: memref<1x128xf32, #tpu.memory_space<vmem>>, %arg6: memref<128x128xbf16, #tpu.memory_space<vmem>>, %arg7: memref<1x128xf32, #tpu.memory_space<vmem>>, %arg8: memref<128x1xf32, #tpu.memory_space<vmem>>, %arg9: memref<8x128xf32, #tpu.memory_space<vmem>>, %arg10: memref<1x1x128xf32, #tpu.memory_space<vmem>>, %arg11: memref<8x128xf32, #tpu.memory_space<vmem>>) attributes {dimension_semantics = [#tpu.dimension_semantics<parallel>, #tpu.dimension_semantics<arbitrary>], iteration_bounds = array<i64: 1, 1>, scalar_prefetch = 0 : i64, scratch_operands = 1 : i64, tpu.core_type = #tpu.core_type<tc>, window_params = [{pipeline_mode = #tpu.pipeline_mode<synchronous>, transform_indices = @transform_0, window_bounds = array<i64: 8, 128>}, {transform_indices = @transform_1, window_bounds = array<i64: 16, 128>}, {pipeline_mode = #tpu.pipeline_mode<synchronous>, transform_indices = @transform_2, window_bounds = array<i64: 128, 128>}, {pipeline_mode = #tpu.pipeline_mode<synchronous>, transform_indices = @transform_3, window_bounds = array<i64: 1, 128>}, {pipeline_mode = #tpu.pipeline_mode<synchronous>, transform_indices = @transform_4, window_bounds = array<i64: 128, 128>}, {pipeline_mode = #tpu.pipeline_mode<synchronous>, transform_indices = @transform_5, window_bounds = array<i64: 1, 128>}, {pipeline_mode = #tpu.pipeline_mode<synchronous>, transform_indices = @transform_6, window_bounds = array<i64: 128, 1>}, {pipeline_mode = #tpu.pipeline_mode<synchronous>, transform_indices = @transform_7, window_bounds = array<i64: 8, 128>}, {transform_indices = @transform_8, window_bounds = array<i64: 1, 1, 128>}]} {
    %c0_i32 = arith.constant 0 : i32
    %0 = arith.cmpi eq, %arg1, %c0_i32 : i32
    %1 = arith.extui %0 : i1 to i32
    %c0_i32_0 = arith.constant 0 : i32
    %2 = arith.cmpi ne, %1, %c0_i32_0 : i32
    scf.if %2 {
      %cst_22 = arith.constant 0.000000e+00 : f32
      %36 = vector.broadcast %cst_22 : f32 to vector<8x128xf32>
      %c0_23 = arith.constant 0 : index
      %c0_24 = arith.constant 0 : index
      %37 = vector.load %arg11[%c0_23, %c0_24] : memref<8x128xf32, #tpu.memory_space<vmem>>, vector<8x128xf32>
      tpu.vector_store %arg11[%c0_23, %c0_24], %36 {strides = array<i32>} : memref<8x128xf32, #tpu.memory_space<vmem>>, vector<8x128xf32>,
    } else {
    }
    %c0 = arith.constant 0 : index
    %c0_1 = arith.constant 0 : index
    %3 = vector.load %arg2[%c0, %c0_1] : memref<8x128xbf16, #tpu.memory_space<vmem>>, vector<8x128xbf16>
    %c0_2 = arith.constant 0 : index
    %c0_3 = arith.constant 0 : index
    %4 = vector.load %arg3[%c0_2, %c0_3] : memref<16x128xbf16, #tpu.memory_space<vmem>>, vector<16x128xbf16>
    %5 = vector.shape_cast %3 : vector<8x128xbf16> to vector<8x1x128xbf16>
    %6 = vector.shape_cast %4 : vector<16x128xbf16> to vector<1x16x128xbf16>
    %7 = vector.broadcast %5 : vector<8x1x128xbf16> to vector<8x16x128xbf16>
    %8 = vector.broadcast %6 : vector<1x16x128xbf16> to vector<8x16x128xbf16>
    %9 = arith.mulf %7, %8 : vector<8x16x128xbf16>
    %10 = vector.shape_cast %9 : vector<8x16x128xbf16> to vector<128x128xbf16>
    %c0_4 = arith.constant 0 : index
    %c0_5 = arith.constant 0 : index
    %11 = vector.load %arg4[%c0_4, %c0_5] : memref<128x128xbf16, #tpu.memory_space<vmem>>, vector<128x128xbf16>
    %cst = arith.constant dense<0.000000e+00> : vector<128x128xf32>
    %12 = tpu.matmul %10, %11, %cst {dimension_numbers = #tpu.dot_dimension_numbers<[1], [0], [0], [1], [0, 0, 1, 1], [], []>} : vector<128x128xbf16>, vector<128x128xbf16>, vector<128x128xf32> -> vector<128x128xf32>
    %c0_6 = arith.constant 0 : index
    %c0_7 = arith.constant 0 : index
    %13 = vector.load %arg5[%c0_6, %c0_7] : memref<1x128xf32, #tpu.memory_space<vmem>>, vector<1x128xf32>
    %14 = vector.broadcast %13 : vector<1x128xf32> to vector<128x128xf32>
    %15 = arith.addf %12, %14 : vector<128x128xf32>
    %cst_8 = arith.constant 0.00999999977 : f32
    %16 = vector.broadcast %cst_8 : f32 to vector<128x128xf32>
    %17 = arith.mulf %16, %15 : vector<128x128xf32>
    %18 = arith.maximumf %15, %17 : vector<128x128xf32>
    %19 = arith.truncf %18 : vector<128x128xf32> to vector<128x128xbf16>
    %c0_9 = arith.constant 0 : index
    %c0_10 = arith.constant 0 : index
    %20 = vector.load %arg6[%c0_9, %c0_10] : memref<128x128xbf16, #tpu.memory_space<vmem>>, vector<128x128xbf16>
    %cst_11 = arith.constant dense<0.000000e+00> : vector<128x128xf32>
    %21 = tpu.matmul %19, %20, %cst_11 {dimension_numbers = #tpu.dot_dimension_numbers<[1], [0], [0], [1], [0, 0, 1, 1], [], []>} : vector<128x128xbf16>, vector<128x128xbf16>, vector<128x128xf32> -> vector<128x128xf32>
    %c0_12 = arith.constant 0 : index
    %c0_13 = arith.constant 0 : index
    %22 = vector.load %arg7[%c0_12, %c0_13] : memref<1x128xf32, #tpu.memory_space<vmem>>, vector<1x128xf32>
    %23 = vector.broadcast %22 : vector<1x128xf32> to vector<128x128xf32>
    %24 = arith.addf %21, %23 : vector<128x128xf32>
    %cst_14 = arith.constant 0.00999999977 : f32
    %25 = vector.broadcast %cst_14 : f32 to vector<128x128xf32>
    %26 = arith.mulf %25, %24 : vector<128x128xf32>
    %27 = arith.maximumf %24, %26 : vector<128x128xf32>
    %c0_15 = arith.constant 0 : index
    %c0_16 = arith.constant 0 : index
    %28 = vector.load %arg11[%c0_15, %c0_16] : memref<8x128xf32, #tpu.memory_space<vmem>>, vector<8x128xf32>
    %29 = vector.shape_cast %27 : vector<128x128xf32> to vector<8x16x128xf32>
    %cst_17 = arith.constant dense<0.000000e+00> : vector<8x128xf32>
    %30 = vector.multi_reduction <add>, %29, %cst_17 [1] : vector<8x16x128xf32> to vector<8x128xf32>
    %31 = arith.addf %28, %30 : vector<8x128xf32>
    %c0_18 = arith.constant 0 : index
    %c0_19 = arith.constant 0 : index
    %32 = vector.load %arg11[%c0_18, %c0_19] : memref<8x128xf32, #tpu.memory_space<vmem>>, vector<8x128xf32>
    tpu.vector_store %arg11[%c0_18, %c0_19], %31 {strides = array<i32>} : memref<8x128xf32, #tpu.memory_space<vmem>>, vector<8x128xf32>,
    %c0_i32_20 = arith.constant 0 : i32
    %33 = arith.cmpi eq, %arg1, %c0_i32_20 : i32
    %34 = arith.extui %33 : i1 to i32
    %c0_i32_21 = arith.constant 0 : i32
    %35 = arith.cmpi ne, %34, %c0_i32_21 : i32
    scf.if %35 {
      %c0_22 = arith.constant 0 : index
      %c0_23 = arith.constant 0 : index
      %36 = vector.load %arg11[%c0_22, %c0_23] : memref<8x128xf32, #tpu.memory_space<vmem>>, vector<8x128xf32>
      %c0_24 = arith.constant 0 : index
      %c0_25 = arith.constant 0 : index
      %37 = vector.load %arg8[%c0_24, %c0_25] : memref<128x1xf32, #tpu.memory_space<vmem>>, vector<128x1xf32>
      %cst_26 = arith.constant dense<0.000000e+00> : vector<8x1xf32>
      %38 = tpu.matmul %36, %37, %cst_26 {dimension_numbers = #tpu.dot_dimension_numbers<[1], [0], [0], [1], [0, 0, 1, 1], [], []>} : vector<8x128xf32>, vector<128x1xf32>, vector<8x1xf32> -> vector<8x1xf32>
      %c0_27 = arith.constant 0 : index
      %c0_28 = arith.constant 0 : index
      %39 = vector.load %arg9[%c0_27, %c0_28] : memref<8x128xf32, #tpu.memory_space<vmem>>, vector<8x128xf32>
      %40 = vector.broadcast %38 : vector<8x1xf32> to vector<8x128xf32>
      %41 = arith.mulf %40, %39 : vector<8x128xf32>
      %cst_29 = arith.constant dense<0.000000e+00> : vector<128xf32>
      %42 = vector.multi_reduction <add>, %41, %cst_29 [0] : vector<8x128xf32> to vector<128xf32>
      %43 = vector.shape_cast %42 : vector<128xf32> to vector<1x128xf32>
      %44 = vector.shape_cast %43 : vector<1x128xf32> to vector<1x1x128xf32>
      %c0_30 = arith.constant 0 : index
      %c0_31 = arith.constant 0 : index
      %c0_32 = arith.constant 0 : index
      %45 = vector.load %arg10[%c0_30, %c0_31, %c0_32] : memref<1x1x128xf32, #tpu.memory_space<vmem>>, vector<1x1x128xf32>
      tpu.vector_store %arg10[%c0_30, %c0_31, %c0_32], %44 {strides = array<i32>} : memref<1x1x128xf32, #tpu.memory_space<vmem>>, vector<1x1x128xf32>,
    } else {
    }
    return
  }
  func.func @transform_0(%arg0: i32, %arg1: i32) -> (i32, i32) {
    %c0_i32 = arith.constant 0 : i32
    %c0_i32_0 = arith.constant 0 : i32
    %c0_i32_1 = arith.constant 0 : i32
    return %c0_i32, %c0_i32_0 : i32, i32
  }
  func.func @transform_1(%arg0: i32, %arg1: i32) -> (i32, i32) {
    %c1_i32 = arith.constant 1 : i32
    %0 = arith.muli %arg0, %c1_i32 : i32
    %1 = arith.addi %0, %arg1 : i32
    %c0_i32 = arith.constant 0 : i32
    %c0_i32_0 = arith.constant 0 : i32
    return %1, %c0_i32 : i32, i32
  }
  func.func @transform_2(%arg0: i32, %arg1: i32) -> (i32, i32) {
    %c0_i32 = arith.constant 0 : i32
    %c0_i32_0 = arith.constant 0 : i32
    %c0_i32_1 = arith.constant 0 : i32
    return %c0_i32, %c0_i32_0 : i32, i32
  }
  func.func @transform_3(%arg0: i32, %arg1: i32) -> (i32, i32) {
    %c0_i32 = arith.constant 0 : i32
    %c0_i32_0 = arith.constant 0 : i32
    %c0_i32_1 = arith.constant 0 : i32
    return %c0_i32, %c0_i32_0 : i32, i32
  }
  func.func @transform_4(%arg0: i32, %arg1: i32) -> (i32, i32) {
    %c0_i32 = arith.constant 0 : i32
    %c0_i32_0 = arith.constant 0 : i32
    %c0_i32_1 = arith.constant 0 : i32
    return %c0_i32, %c0_i32_0 : i32, i32
  }
  func.func @transform_5(%arg0: i32, %arg1: i32) -> (i32, i32) {
    %c0_i32 = arith.constant 0 : i32
    %c0_i32_0 = arith.constant 0 : i32
    %c0_i32_1 = arith.constant 0 : i32
    return %c0_i32, %c0_i32_0 : i32, i32
  }
  func.func @transform_6(%arg0: i32, %arg1: i32) -> (i32, i32) {
    %c0_i32 = arith.constant 0 : i32
    %c0_i32_0 = arith.constant 0 : i32
    %c0_i32_1 = arith.constant 0 : i32
    return %c0_i32, %c0_i32_0 : i32, i32
  }
  func.func @transform_7(%arg0: i32, %arg1: i32) -> (i32, i32) {
    %c0_i32 = arith.constant 0 : i32
    %c0_i32_0 = arith.constant 0 : i32
    %c0_i32_1 = arith.constant 0 : i32
    return %c0_i32, %c0_i32_0 : i32, i32
  }
  func.func @transform_8(%arg0: i32, %arg1: i32) -> (i32, i32, i32) {
    %c0_i32 = arith.constant 0 : i32
    %c0_i32_0 = arith.constant 0 : i32
    %c0_i32_1 = arith.constant 0 : i32
    return %arg0, %c0_i32, %c0_i32_0 : i32, i32, i32
  }
}

</mosaic_0001>

<bundles_post_ra>
// kernel: affinity_head.1
= control target key start
LH: loop header
LB: loop body
LE: loop exit
PB: predicated region body
PF: predicated region fallthrough
CT: control target
= control target key end

     0   :  { %v72_v0 = vlaneseq  ;;  %v1026_v2 = vmov 1966171168   ;;  %vm1028_vm0 = vmmov 0   ;;  %vm676_vm1 = vcmask 1041409   ;;  %s1254_s2 = inlined_call_operand.vmem [shape: bf16[128,128], index: 2, kind: input, shape index: {}]   ;;  %s1255_s0 = inlined_call_operand.vmem [shape: bf16[8,128], index: 0, kind: input, shape index: {}]   ;;  %s1256_s1 = inlined_call_operand.vmem [shape: bf16[16,128], index: 1, kind: input, shape index: {}]   ;;  %s1257_s4 = inlined_call_operand.vmem [shape: bf16[128,128], index: 4, kind: input, shape index: {}]   ;;  %s1258_s3 = inlined_call_operand.vmem [shape: f32[1,128], index: 3, kind: input, shape index: {}]   ;;  %s1259_s6 = inlined_call_operand.vmem [shape: f32[128,1], index: 6, kind: input, shape index: {}]   ;;  %s1260_s5 = inlined_call_operand.vmem [shape: f32[1,128], index: 5, kind: input, shape index: {}]   ;;  %s1261_s7 = inlined_call_operand.vmem [shape: f32[8,128], index: 7, kind: input, shape index: {}]   ;;  %s1262_s8 = inlined_call_operand.vmem [shape: f32[1,1,128], index: 8, kind: output, shape index: {}]  }
   0x1   :  { %v1009_v1 = vld [vmem:[%s1254_s2] sm:$0xff]   ;;  %v70_v3 = vunpack.c.l.s4 %v1026_v2  ;;  %v1010_v4 = vld [vmem:[%s1254_s2 + $0x8] sm:$0xff]   ;;  %v1011_v7 = vld [vmem:[%s1254_s2 + $0x10] sm:$0xff]   ;;  %vm678_vm2 = vcmask 1042434   ;;  %vm680_vm3 = vcmask 1043459   ;;  %vm682_vm4 = vcmask 1044484  }
   0x2   :  { %v73_v5 = vshrl.u32 %v72_v0, 7  ;;  %880 = vmatprep.subr.bf16.mxu0 %v1009_v1  ;;  %v1012_v9 = vld [vmem:[%s1254_s2 + $0x18] sm:$0xff]   ;;  %v807_v10 = vld.sshfl [vmem:[%s1255_s0] sm:$0x33 pattern:$0x75316420] }
   0x3   :  { %v71_v6 = vunpack.c.0.s8 %v70_v3  ;;  %881 = vmatpush3.bf16.msra.mxu0 %v1009_v1  ;;  %v68_v11 = vcombine.high %v807_v10, %v807_v10  ;;  %v1018_v14 = vld [vmem:[%s1257_s4] sm:$0xff]   ;;  %v1019_v18 = vld [vmem:[%s1257_s4 + $0x8] sm:$0xff]   ;;  %v1020_v23 = vld [vmem:[%s1257_s4 + $0x10] sm:$0xff]   ;;  %vm684_vm5 = vcmask 1045509   ;;  %vm686_vm6 = vcmask 1046534  }
   0x4   :  { %882 = vmatprep.subr.bf16.mxu0 %v1010_v4  ;;  %v1091_v13 = vsub.s32 0, %v73_v5  ;;  %v1013_v19 = vld [vmem:[%s1254_s2 + $0x20] sm:$0xff]   ;;  %912 = vmatprep.subr.bf16.mxu1 %v1018_v14  ;;  %v1014_v26 = vld [vmem:[%s1254_s2 + $0x28] sm:$0xff]   ;;  %v1021_v30 = vld [vmem:[%s1257_s4 + $0x18] sm:$0xff]   ;;  %vm688_vm7 = vcmask 1047559  }
   0x5   :  { %v74_v8 = vsub.s32 %v71_v6, %v73_v5  ;;  %v1106_v21 = vld [vmem:[%s1256_s1] sm:$0xff]   ;;  %913 = vmatpush3.bf16.msra.mxu1 %v1018_v14  ;;  %v1015_v34 = vld [vmem:[%s1254_s2 + $0x30] sm:$0xff]   ;;  %v1016_v40 = vld [vmem:[%s1254_s2 + $0x38] sm:$0xff]  }
   0x6   :  { %914 = vmatprep.subr.bf16.mxu1 %v1019_v18  ;;  %v1022_v37 = vld [vmem:[%s1257_s4 + $0x20] sm:$0xff]  }
   0x7   :  { %883 = vmatpush3.bf16.msra.mxu0 %v1010_v4  ;;  %v75_v12 = vrot.slane %v807_v10, %v74_v8  ;;  %v82_v17 = vrot.slane %v68_v11, %v74_v8  ;;  %v1024_v8 = vld [vmem:[%s1257_s4 + $0x30] sm:$0xff]   ;;  %v1161_v10 = vld [vmem:[%s1258_s3] ss:$0 sm:$0xff] }
   0x8   :  { %884 = vmatprep.subr.bf16.mxu0 %v1011_v7 }
   0x9   :  { %v808_v15 = vpack.i.b16 %v75_v12, %v75_v12  ;;  %v86_v16 = vunpack.i.h.s16 %v75_v12  ;;  %v809_v25 = vpack.i.b16 %v82_v17, %v82_v17  ;;  %915 = vmatpush3.bf16.msra.mxu1 %v1019_v18  ;;  %v88_v29 = vunpack.i.h.s16 %v82_v17 }
   0xa   :  { %916 = vmatprep.subr.bf16.mxu1 %v1020_v23  ;;  %v83_v33 = vcombine.high %v75_v12, %v75_v12  ;;  %v84_v46 = vcombine.high %v82_v17, %v82_v17 }
   0xb   :  { %885 = vmatpush3.bf16.msra.mxu0 %v1011_v7  ;;  %v104_v20 = vrot.slane %v808_v15, %v1091_v13  ;;  %v94_v22 = vpack.i.b16 %v86_v16, %v86_v16  ;;  %v112_v32 = vrot.slane %v809_v25, %v1091_v13  ;;  %v96_v36 = vpack.i.b16 %v88_v29, %v88_v29  ;;  %v1023_v7 = vld [vmem:[%s1257_s4 + $0x28] sm:$0xff]  }
   0xc   :  { %886 = vmatprep.subr.bf16.mxu0 %v1012_v9  ;;  %v810_v39 = vpack.i.b16 %v83_v33, %v83_v33  ;;  %v90_v43 = vunpack.i.h.s16 %v83_v33  ;;  %v811_v52 = vpack.i.b16 %v84_v46, %v84_v46  ;;  %v92_v55 = vunpack.i.h.s16 %v84_v46 }
   0xd   :  { %v134_v24 = vpack.i.b16 %v104_v20, %v104_v20  ;;  %v108_v28 = vrot.slane %v94_v22, %v1091_v13  ;;  %917 = vmatpush3.bf16.msra.mxu1 %v1020_v23  ;;  %v148_v38 = vpack.i.b16 %v112_v32, %v112_v32  ;;  %v116_v42 = vrot.slane %v96_v36, %v1091_v13 }
   0xe   :  { %918 = vmatprep.subr.bf16.mxu1 %v1021_v30  ;;  %v120_v45 = vrot.slane %v810_v39, %v1091_v13  ;;  %v98_v49 = vpack.i.b16 %v90_v43, %v90_v43  ;;  %v128_v57 = vrot.slane %v811_v52, %v1091_v13  ;;  %v100_v60 = vpack.i.b16 %v92_v55, %v92_v55 }
   0xf   :  { %887 = vmatpush3.bf16.msra.mxu0 %v1012_v9  ;;  %v139_v27 = vrot.slane %v134_v24, %v1091_v13  ;;  %v141_v35 = vpack.i.b16 %v108_v28, %v108_v28  ;;  %v153_v44 = vrot.slane %v148_v38, %v1091_v13  ;;  %v155_v48 = vpack.i.b16 %v116_v42, %v116_v42  ;;  %v1025_v9 = vld [vmem:[%s1257_s4 + $0x38] sm:$0xff]  }
  0x10   :  { %888 = vmatprep.subr.bf16.mxu0 %v1013_v19  ;;  %v162_v51 = vpack.i.b16 %v120_v45, %v120_v45  ;;  %v124_v54 = vrot.slane %v98_v49, %v1091_v13  ;;  %v176_v62 = vpack.i.b16 %v128_v57, %v128_v57  ;;  %v132_v0 = vrot.slane %v100_v60, %v1091_v13 }
  0x11   :  { %v195_v31 = vmul.bf16 %v1106_v21, %v139_v27  ;;  %919 = vmatpush3.bf16.msra.mxu1 %v1021_v30  ;;  %v146_v41 = vrot.slane %v141_v35, %v1091_v13  ;;  %v197_v50 = vmul.bf16 %v1106_v21, %v153_v44  ;;  %v160_v53 = vrot.slane %v155_v48, %v1091_v13 }
  0x12   :  { %920 = vmatprep.subr.bf16.mxu1 %v1022_v37  ;;  %v167_v56 = vrot.slane %v162_v51, %v1091_v13  ;;  %v169_v59 = vpack.i.b16 %v124_v54, %v124_v54  ;;  %v181_v1 = vrot.slane %v176_v62, %v1091_v13  ;;  %v183_v3 = vpack.i.b16 %v132_v0, %v132_v0 }
  0x13   :  { %889 = vmatpush3.bf16.msra.mxu0 %v1013_v19  ;;  %896 = vmatprep.mubr.bf16.mxu0 %v195_v31  ;;  %v196_v47 = vmul.bf16 %v1106_v21, %v146_v41  ;;  %v198_v58 = vmul.bf16 %v1106_v21, %v160_v53 }
  0x14   :  { %890 = vmatprep.subr.bf16.mxu0 %v1014_v26  ;;  %v199_v61 = vmul.bf16 %v1106_v21, %v167_v56  ;;  %v174_v63 = vrot.slane %v169_v59, %v1091_v13  ;;  %v201_v4 = vmul.bf16 %v1106_v21, %v181_v1  ;;  %v188_v5 = vrot.slane %v183_v3, %v1091_v13 }
  0x15   :  { %921 = vmatpush3.bf16.msra.mxu1 %v1022_v37 }
  0x16   :  { %v200_v2 = vmul.bf16 %v1106_v21, %v174_v63  ;;  %v202_v6 = vmul.bf16 %v1106_v21, %v188_v5  ;;  %922 = vmatprep.subr.bf16.mxu1 %v1023_v7 }
  0x17   :  { %891 = vmatpush3.bf16.msra.mxu0 %v1014_v26 }
  0x18   :  { %892 = vmatprep.subr.bf16.mxu0 %v1015_v34 }
  0x19   :  { %923 = vmatpush3.bf16.msra.mxu1 %v1023_v7 }
  0x1a   :  { %924 = vmatprep.subr.bf16.mxu1 %v1024_v8 }
  0x1b   :  { %893 = vmatpush3.bf16.msra.mxu0 %v1015_v34 }
  0x1c   :  { %894 = vmatprep.subr.bf16.mxu0 %v1016_v40 }
  0x1d   :  { %925 = vmatpush3.bf16.msra.mxu1 %v1024_v8 }
  0x1e   :  { %926 = vmatprep.subr.bf16.mxu1 %v1025_v9 }
  0x1f   :  { %895 = vmatpush3.bf16.msra.mxu0 %v1016_v40 }
  0x21   :  { %927 = vmatpush3.bf16.msra.mxu1 %v1025_v9 }
  0x22   :  { %897 = vmatmul.mubr.bf16.vlgmr.msra.gmra.mrb[0].mxu0 %v196_v47 }
  0x23   :  { %900 = vmatprep.mubr.bf16.mxu0 %v197_v50 }
  0x2a   :  { %901 = vmatmul.mubr.bf16.gmra.mrb[4].mxu0 %v198_v58 }
  0x2b   :  { %904 = vmatprep.mubr.bf16.mxu0 %v199_v61 }
  0x32   :  { %905 = vmatmul.mubr.bf16.gmra.mrb[8].mxu0 %v200_v2 }
  0x33   :  { %908 = vmatprep.mubr.bf16.mxu0 %v201_v4 }
  0x3a   :  { %909 = vmatmul.mubr.bf16.gmra.mrb[12].mxu0 %v202_v6 }
  0xf5   :  { %v898_v11 = vpop.f32.mrb[0].mxu0 }
  0xf6   :  { %v317_v12 = vadd.f32 %v898_v11, %v1161_v10  ;;  %v308_v13 = vpop.f32.mrb[1].mxu0 }
  0xf7   :  { %v309_v14 = vadd.f32 %v1161_v10, %v308_v13  ;;  %v899_v15 = vpop.f32.mrb[2].mxu0 }
  0xf8   :  { %v373_v16 = vmul.f32 0.01, %v317_v12  ;;  %v320_v17 = vadd.f32 %v899_v15, %v1161_v10  ;;  %v311_v18 = vpop.f32.mrb[3].mxu0 }
  0xf9   :  { %v371_v19 = vmul.f32 0.01, %v309_v14  ;;  %v312_v20 = vadd.f32 %v1161_v10, %v311_v18 }
  0xfa   :  { %v374_v21 = vmul.f32 0.01, %v320_v17  ;;  %v389_v23 = vmax.f32 %v317_v12, %v373_v16 }
  0xfb   :  { %v372_v22 = vmul.f32 0.01, %v312_v20  ;;  %v387_v26 = vmax.f32 %v309_v14, %v371_v19 }
  0xfc   :  { %v390_v24 = vmax.f32 %v320_v17, %v374_v21 }
  0xfd   :  { %v902_v25 = vpop.f32.mrb[4].mxu0  ;;  %v388_v27 = vmax.f32 %v312_v20, %v372_v22  ;;  %v697_v20 = vld [vmem:[%s1259_s6] sm:$0xff]  ;;  %v1027_v22 = vmov 0.0|0.0  }
  0xfe   :  { %v333_v28 = vadd.f32 %v902_v25, %v1161_v10  ;;  %v324_v29 = vpop.f32.mrb[5].mxu0  ;;  %v404_v30 = vpack.c.bf16 %v390_v24, %v389_v23  ;;  %979 = vmatprep.subr.bf16.mxu0 %v1027_v22  ;;  %v699_v23 = vld [vmem:[%s1259_s6 + $0x10] sm:$0xff]  ;;  %v700_v24 = vld [vmem:[%s1259_s6 + $0x18] sm:$0xff] }
  0xff   :  { %v325_v31 = vadd.f32 %v1161_v10, %v324_v29  ;;  %v903_v32 = vpop.f32.mrb[6].mxu0  ;;  %v403_v33 = vpack.c.bf16 %v388_v27, %v387_v26  ;;  %v983_v25 = vpack.c.bf16 %v700_v24, %v699_v23  ;;  %v701_v26 = vld [vmem:[%s1259_s6 + $0x20] sm:$0xff]  ;;  %v702_v27 = vld [vmem:[%s1259_s6 + $0x28] sm:$0xff]  ;;  %v703_v29 = vld [vmem:[%s1259_s6 + $0x30] sm:$0xff] }
 0x100   :  { %v377_v34 = vmul.f32 0.01, %v333_v28  ;;  %v336_v35 = vadd.f32 %v903_v32, %v1161_v10  ;;  %v327_v36 = vpop.f32.mrb[7].mxu0  ;;  %v705_v32 = vld [vmem:[%s1259_s6 + $0x40] sm:$0xff] }
 0x101   :  { %v375_v37 = vmul.f32 0.01, %v325_v31  ;;  %v328_v38 = vadd.f32 %v1161_v10, %v327_v36  ;;  %928 = vmatprep.mubr.bf16.mxu1 %v403_v33  ;;  %v706_v33 = vld [vmem:[%s1259_s6 + $0x48] sm:$0xff]  ;;  %v708_v36 = vld [vmem:[%s1259_s6 + $0x58] sm:$0xff] }
 0x102   :  { %v378_v39 = vmul.f32 0.01, %v336_v35  ;;  %929 = vmatmul.mubr.bf16.vlgmr.msra.gmra.mrb[0].mxu1 %v404_v30  ;;  %v393_v41 = vmax.f32 %v333_v28, %v377_v34  ;;  %v986_v28 = vpack.c.bf16 %v702_v27, %v701_v26  ;;  %v704_v30 = vld [vmem:[%s1259_s6 + $0x38] sm:$0xff]  ;;  %v992_v34 = vpack.c.bf16 %v706_v33, %v705_v32 }
 0x103   :  { %v376_v40 = vmul.f32 0.01, %v328_v38  ;;  %v391_v43 = vmax.f32 %v325_v31, %v375_v37  ;;  %v989_v31 = vpack.c.bf16 %v704_v30, %v703_v29 }
 0x104   :  { %v394_v42 = vmax.f32 %v336_v35, %v378_v39  ;;  %v707_v35 = vld [vmem:[%s1259_s6 + $0x50] sm:$0xff]  ;;  %v710_v39 = vld [vmem:[%s1259_s6 + $0x68] sm:$0xff] }
 0x105   :  { %v392_v44 = vmax.f32 %v328_v38, %v376_v40  ;;  %v906_v45 = vpop.f32.mrb[8].mxu0  ;;  %v995_v37 = vpack.c.bf16 %v708_v36, %v707_v35  ;;  %v709_v38 = vld [vmem:[%s1259_s6 + $0x60] sm:$0xff] }
 0x106   :  { %v349_v46 = vadd.f32 %v906_v45, %v1161_v10  ;;  %v340_v47 = vpop.f32.mrb[9].mxu0  ;;  %v406_v48 = vpack.c.bf16 %v394_v42, %v393_v41  ;;  %v998_v40 = vpack.c.bf16 %v710_v39, %v709_v38  ;;  %v711_v41 = vld [vmem:[%s1259_s6 + $0x70] sm:$0xff]  ;;  %v712_v42 = vld [vmem:[%s1259_s6 + $0x78] sm:$0xff]  ;;  %v1030_v45 = vmov 0  }
 0x107   :  { %v341_v49 = vadd.f32 %v1161_v10, %v340_v47  ;;  %v907_v50 = vpop.f32.mrb[10].mxu0  ;;  %v405_v51 = vpack.c.bf16 %v392_v44, %v391_v43  ;;  %v1001_v43 = vpack.c.bf16 %v712_v42, %v711_v41  ;;  %v1029_v44 = vmov 0.0   ;;  %1008 = vset.pattern.permute.xlu0 %v1030_v45 }
 0x108   :  { %v381_v52 = vmul.f32 0.01, %v349_v46  ;;  %v352_v53 = vadd.f32 %v907_v50, %v1161_v10  ;;  %v343_v54 = vpop.f32.mrb[11].mxu0  ;;  %976 = vmatprep.mubr.msk.f32.mxu0 %vm1028_vm0, %v1029_v44 }
 0x109   :  { %v379_v55 = vmul.f32 0.01, %v341_v49  ;;  %v344_v56 = vadd.f32 %v1161_v10, %v343_v54  ;;  %932 = vmatprep.mubr.bf16.mxu1 %v405_v51 }
 0x10a   :  { %v382_v57 = vmul.f32 0.01, %v352_v53  ;;  %933 = vmatmul.mubr.bf16.gmra.mrb[4].mxu1 %v406_v48  ;;  %v397_v59 = vmax.f32 %v349_v46, %v381_v52  ;;  %v1230_v46 = vld [vmem:[%s1260_s5] ss:$0 sm:$0xff] }
 0x10b   :  { %v380_v58 = vmul.f32 0.01, %v344_v56  ;;  %v395_v61 = vmax.f32 %v341_v49, %v379_v55 }
 0x10c   :  { %v398_v60 = vmax.f32 %v352_v53, %v382_v57 }
 0x10d   :  { %v396_v62 = vmax.f32 %v344_v56, %v380_v58  ;;  %v910_v63 = vpop.f32.mrb[12].mxu0 }
 0x10e   :  { %v365_v0 = vadd.f32 %v910_v63, %v1161_v10  ;;  %v356_v1 = vpop.f32.mrb[13].mxu0  ;;  %v408_v2 = vpack.c.bf16 %v398_v60, %v397_v59 }
 0x10f   :  { %v357_v3 = vadd.f32 %v1161_v10, %v356_v1  ;;  %v911_v4 = vpop.f32.mrb[14].mxu0  ;;  %v407_v5 = vpack.c.bf16 %v396_v62, %v395_v61 }
 0x110   :  { %v385_v6 = vmul.f32 0.01, %v365_v0  ;;  %v368_v7 = vadd.f32 %v911_v4, %v1161_v10  ;;  %v359_v8 = vpop.f32.mrb[15].mxu0 }
 0x111   :  { %v383_v9 = vmul.f32 0.01, %v357_v3  ;;  %v360_v11 = vadd.f32 %v1161_v10, %v359_v8  ;;  %936 = vmatprep.mubr.bf16.mxu1 %v407_v5  ;;  %v698_v10 = vld [vmem:[%s1259_s6 + $0x8] sm:$0xff] }
 0x112   :  { %v386_v12 = vmul.f32 0.01, %v368_v7  ;;  %937 = vmatmul.mubr.bf16.gmra.mrb[8].mxu1 %v408_v2  ;;  %v401_v14 = vmax.f32 %v365_v0, %v385_v6  ;;  %v980_v21 = vpack.c.bf16 %v698_v10, %v697_v20 }
 0x113   :  { %v384_v13 = vmul.f32 0.01, %v360_v11  ;;  %v399_v16 = vmax.f32 %v357_v3, %v383_v9 }
 0x114   :  { %v402_v15 = vmax.f32 %v368_v7, %v386_v12  ;;  %981 = vmatpush3.bf16.msra.mxu0 %v980_v21 }
 0x115   :  { %v400_v17 = vmax.f32 %v360_v11, %v384_v13  ;;  %982 = vmatprep.subr.bf16.mxu0 %v1027_v22 }
 0x116   :  { %v410_v18 = vpack.c.bf16 %v402_v15, %v401_v14 }
 0x117   :  { %v409_v19 = vpack.c.bf16 %v400_v17, %v399_v16 }
 0x118   :  { %984 = vmatpush3.bf16.msra.mxu0 %v983_v25 }
 0x119   :  { %940 = vmatprep.mubr.bf16.mxu1 %v409_v19  ;;  %985 = vmatprep.subr.bf16.mxu0 %v1027_v22 }
 0x11a   :  { %941 = vmatmul.mubr.bf16.gmra.mrb[12].mxu1 %v410_v18 }
 0x11c   :  { %987 = vmatpush3.bf16.msra.mxu0 %v986_v28 }
 0x11d   :  { %988 = vmatprep.subr.bf16.mxu0 %v1027_v22 }
 0x120   :  { %990 = vmatpush3.bf16.msra.mxu0 %v989_v31 }
 0x121   :  { %991 = vmatprep.subr.bf16.mxu0 %v1027_v22 }
 0x124   :  { %993 = vmatpush3.bf16.msra.mxu0 %v992_v34 }
 0x125   :  { %994 = vmatprep.subr.bf16.mxu0 %v1027_v22 }
 0x128   :  { %996 = vmatpush3.bf16.msra.mxu0 %v995_v37 }
 0x129   :  { %997 = vmatprep.subr.bf16.mxu0 %v1027_v22 }
 0x12c   :  { %999 = vmatpush3.bf16.msra.mxu0 %v998_v40 }
 0x12d   :  { %1000 = vmatprep.subr.bf16.mxu0 %v1027_v22 }
 0x130   :  { %1002 = vmatpush3.bf16.msra.mxu0 %v1001_v43 }
 0x1d5   :  { %v930_v47 = vpop.f32.mrb[0].mxu1 }
 0x1d6   :  { %v525_v48 = vadd.f32 %v930_v47, %v1230_v46  ;;  %v516_v49 = vpop.f32.mrb[1].mxu1 }
 0x1d7   :  { %v517_v50 = vadd.f32 %v1230_v46, %v516_v49  ;;  %v931_v51 = vpop.f32.mrb[2].mxu1 }
 0x1d8   :  { %v581_v52 = vmul.f32 0.01, %v525_v48  ;;  %v528_v53 = vadd.f32 %v931_v51, %v1230_v46  ;;  %v519_v54 = vpop.f32.mrb[3].mxu1 }
 0x1d9   :  { %v579_v55 = vmul.f32 0.01, %v517_v50  ;;  %v520_v56 = vadd.f32 %v1230_v46, %v519_v54 }
 0x1da   :  { %v582_v57 = vmul.f32 0.01, %v528_v53  ;;  %v597_v59 = vmax.f32 %v525_v48, %v581_v52 }
 0x1db   :  { %v580_v58 = vmul.f32 0.01, %v520_v56  ;;  %v595_v61 = vmax.f32 %v517_v50, %v579_v55 }
 0x1dc   :  { %v598_v60 = vmax.f32 %v528_v53, %v582_v57 }
 0x1dd   :  { %v596_v62 = vmax.f32 %v520_v56, %v580_v58  ;;  %v934_v63 = vpop.f32.mrb[4].mxu1 }
 0x1de   :  { %v619_v0 = vadd.f32 %v598_v60, %v597_v59  ;;  %v541_v1 = vadd.f32 %v934_v63, %v1230_v46  ;;  %v532_v2 = vpop.f32.mrb[5].mxu1 }
 0x1df   :  { %v612_v3 = vadd.f32 %v596_v62, %v595_v61  ;;  %v533_v4 = vadd.f32 %v1230_v46, %v532_v2  ;;  %v935_v5 = vpop.f32.mrb[6].mxu1 }
 0x1e0   :  { %v620_v6 = vrot.slane %v619_v0, 4  ;;  %v585_v7 = vmul.f32 0.01, %v541_v1  ;;  %v544_v8 = vadd.f32 %v935_v5, %v1230_v46  ;;  %v535_v9 = vpop.f32.mrb[7].mxu1 }
 0x1e1   :  { %v613_v11 = vrot.slane %v612_v3, 4  ;;  %v583_v12 = vmul.f32 0.01, %v533_v4  ;;  %v536_v13 = vadd.f32 %v1230_v46, %v535_v9 }
 0x1e2   :  { %v621_v14 = vadd.f32 %v620_v6, %v619_v0  ;;  %v586_v15 = vmul.f32 0.01, %v544_v8  ;;  %v601_v19 = vmax.f32 %v541_v1, %v585_v7 }
 0x1e3   :  { %v614_v16 = vadd.f32 %v613_v11, %v612_v3  ;;  %v584_v17 = vmul.f32 0.01, %v536_v13  ;;  %v599_v21 = vmax.f32 %v533_v4, %v583_v12 }
 0x1e4   :  { %v622_v18 = vrot.slane %v621_v14, 2  ;;  %v602_v20 = vmax.f32 %v544_v8, %v586_v15 }
 0x1e5   :  { %v615_v10 = vrot.slane %v614_v16, 2  ;;  %v600_v22 = vmax.f32 %v536_v13, %v584_v17  ;;  %v938_v23 = vpop.f32.mrb[8].mxu1 }
 0x1e6   :  { %v623_v24 = vadd.f32 %v622_v18, %v621_v14  ;;  %v633_v25 = vadd.f32 %v602_v20, %v601_v19  ;;  %v557_v26 = vadd.f32 %v938_v23, %v1230_v46  ;;  %v548_v27 = vpop.f32.mrb[9].mxu1 }
 0x1e7   :  { %v616_v28 = vadd.f32 %v615_v10, %v614_v16  ;;  %v626_v29 = vadd.f32 %v600_v22, %v599_v21  ;;  %v549_v30 = vadd.f32 %v1230_v46, %v548_v27  ;;  %v939_v31 = vpop.f32.mrb[10].mxu1 }
 0x1e8   :  { %v624_v32 = vrot.slane %v623_v24, 1  ;;  %v634_v33 = vrot.slane %v633_v25, 4  ;;  %v589_v34 = vmul.f32 0.01, %v557_v26  ;;  %v560_v35 = vadd.f32 %v939_v31, %v1230_v46  ;;  %v551_v36 = vpop.f32.mrb[11].mxu1 }
 0x1e9   :  { %v617_v37 = vrot.slane %v616_v28, 1  ;;  %v627_v38 = vrot.slane %v626_v29, 4  ;;  %v587_v39 = vmul.f32 0.01, %v549_v30  ;;  %v552_v40 = vadd.f32 %v1230_v46, %v551_v36 }
 0x1ea   :  { %v625_v41 = vadd.f32 %v624_v32, %v623_v24  ;;  %v635_v42 = vadd.f32 %v634_v33, %v633_v25  ;;  %v590_v43 = vmul.f32 0.01, %v560_v35  ;;  %v605_v49 = vmax.f32 %v557_v26, %v589_v34 }
 0x1eb   :  { %v618_v44 = vadd.f32 %v617_v37, %v616_v28  ;;  %v628_v45 = vadd.f32 %v627_v38, %v626_v29  ;;  %v588_v47 = vmul.f32 0.01, %v552_v40  ;;  %v603_v53 = vmax.f32 %v549_v30, %v587_v39 }
 0x1ec   :  { %v636_v48 = vrot.slane %v635_v42, 2  ;;  %v606_v50 = vmax.f32 %v560_v35, %v590_v43 }
 0x1ed   :  { %v677_v51 = vsel %vm676_vm1, %v625_v41, %v618_v44  ;;  %v629_v52 = vrot.slane %v628_v45, 2  ;;  %v604_v54 = vmax.f32 %v552_v40, %v588_v47  ;;  %v942_v55 = vpop.f32.mrb[12].mxu1 }
 0x1ee   :  { %v637_v56 = vadd.f32 %v636_v48, %v635_v42  ;;  %v647_v57 = vadd.f32 %v606_v50, %v605_v49  ;;  %v573_v58 = vadd.f32 %v942_v55, %v1230_v46  ;;  %v564_v59 = vpop.f32.mrb[13].mxu1  ;;  %v783_v49 = vld [vmem:[%s1261_s7] sm:$0xff] }
 0x1ef   :  { %v630_v60 = vadd.f32 %v629_v52, %v628_v45  ;;  %v640_v61 = vadd.f32 %v604_v54, %v603_v53  ;;  %v565_v62 = vadd.f32 %v1230_v46, %v564_v59  ;;  %v943_v63 = vpop.f32.mrb[14].mxu1 }
 0x1f0   :  { %v638_v0 = vrot.slane %v637_v56, 1  ;;  %v648_v1 = vrot.slane %v647_v57, 4  ;;  %v593_v2 = vmul.f32 0.01, %v573_v58  ;;  %v576_v3 = vadd.f32 %v943_v63, %v1230_v46  ;;  %v567_v4 = vpop.f32.mrb[15].mxu1 }
 0x1f1   :  { %v631_v5 = vrot.slane %v630_v60, 1  ;;  %v641_v6 = vrot.slane %v640_v61, 4  ;;  %v591_v7 = vmul.f32 0.01, %v565_v62  ;;  %v568_v8 = vadd.f32 %v1230_v46, %v567_v4 }
 0x1f2   :  { %v649_v9 = vadd.f32 %v648_v1, %v647_v57  ;;  %v594_v11 = vmul.f32 0.01, %v576_v3  ;;  %v639_v15 = vadd.f32 %v638_v0, %v637_v56  ;;  %v609_v17 = vmax.f32 %v573_v58, %v593_v2 }
 0x1f3   :  { %v632_v12 = vadd.f32 %v631_v5, %v630_v60  ;;  %v642_v13 = vadd.f32 %v641_v6, %v640_v61  ;;  %v592_v14 = vmul.f32 0.01, %v568_v8  ;;  %v607_v10 = vmax.f32 %v565_v62, %v591_v7 }
 0x1f4   :  { %v650_v16 = vrot.slane %v649_v9, 2  ;;  %v610_v18 = vmax.f32 %v576_v3, %v594_v11 }
 0x1f5   :  { %v679_v19 = vsel %vm678_vm2, %v632_v12, %v677_v51  ;;  %v643_v20 = vrot.slane %v642_v13, 2  ;;  %v608_v21 = vmax.f32 %v568_v8, %v592_v14 }
 0x1f6   :  { %v651_v22 = vadd.f32 %v650_v16, %v649_v9  ;;  %v661_v23 = vadd.f32 %v610_v18, %v609_v17  ;;  %v681_v24 = vsel %vm680_vm3, %v639_v15, %v679_v19 }
 0x1f7   :  { %v644_v25 = vadd.f32 %v643_v20, %v642_v13  ;;  %v654_v46 = vadd.f32 %v608_v21, %v607_v10 }
 0x1f8   :  { %v652_v26 = vrot.slane %v651_v22, 1  ;;  %v662_v27 = vrot.slane %v661_v23, 4 }
 0x1f9   :  { %v645_v28 = vrot.slane %v644_v25, 1  ;;  %v655_v29 = vrot.slane %v654_v46, 4 }
 0x1fa   :  { %v663_v30 = vadd.f32 %v662_v27, %v661_v23  ;;  %v653_v33 = vadd.f32 %v652_v26, %v651_v22 }
 0x1fb   :  { %v646_v31 = vadd.f32 %v645_v28, %v644_v25  ;;  %v656_v32 = vadd.f32 %v655_v29, %v654_v46 }
 0x1fc   :  { %v664_v34 = vrot.slane %v663_v30, 2 }
 0x1fd   :  { %v657_v35 = vrot.slane %v656_v32, 2  ;;  %v683_v36 = vsel %vm682_vm4, %v646_v31, %v681_v24 }
 0x1fe   :  { %v665_v37 = vadd.f32 %v664_v34, %v663_v30  ;;  %v685_v38 = vsel %vm684_vm5, %v653_v33, %v683_v36 }
 0x1ff   :  { %v658_v39 = vadd.f32 %v657_v35, %v656_v32 }
 0x200   :  { %v666_v40 = vrot.slane %v665_v37, 1 }
 0x201   :  { %v659_v41 = vrot.slane %v658_v39, 1 }
 0x202   :  { %v667_v43 = vadd.f32 %v666_v40, %v665_v37 }
 0x203   :  { %v660_v42 = vadd.f32 %v659_v41, %v658_v39 }
 0x205   :  { %v687_v44 = vsel %vm686_vm6, %v660_v42, %v685_v38 }
 0x206   :  { %v689_v45 = vsel %vm688_vm7, %v667_v43, %v687_v44 }
 0x207   :  { %977 = vmatmul.mubr.f32.vlgmr.msra.gmra.mrb[16].mxu0 %v689_v45 }
 0x2da   :  { %v779_v47 = vpop.f32.mrb[16].mxu0 }
 0x2db   :  { %786 = vperm.xlu0 %1008, %v779_v47   ;;  %v978_v48 = vpop.f32.mrb[17].mxu0 }
 0x35a   :  { %v787_v50 = vpop.permute.xlu0 %786 }
 0x35b   :  { %v789_v51 = vmul.f32 %v787_v50, %v783_v49 }
 0x35d   :  { %v790_v52 = vrot.slane %v789_v51, 4 }
 0x35f   :  { %v791_v53 = vadd.f32 %v790_v52, %v789_v51 }
 0x361   :  { %v792_v54 = vrot.slane %v791_v53, 2 }
 0x363   :  { %v793_v55 = vadd.f32 %v792_v54, %v791_v53 }
 0x365   :  { %v794_v56 = vrot.slane %v793_v55, 1 }
 0x367   :  { %v795_v57 = vadd.f32 %v794_v56, %v793_v55 }
 0x369   :  { %796 = vst [vmem:[%s1262_s8] sm:$0x1] %v795_v57 }

</bundles_post_ra>
